<compile_context>
chip_gen: v6e
topology: v6e:2x2x1
jax: 0.10.0
libtpu: 0.0.40
codegen_flags: <defaults>
</compile_context>

<pallas_src>
import jax
import jax.numpy as jnp
from jax.experimental import pallas as pl
from jax.experimental.pallas import tpu as pltpu

LANE = 128  # vreg lane width


def _tpu_kind():
    try:
        return jax.devices()[0].device_kind.lower()
    except Exception:
        return ""


def _make_swish_kernel(beta, compute_dtype, approx_recip):
    beta = float(beta)

    def _swish_kernel(x_ref, o_ref):
        # sigmoid(beta*x) = 1 / (1 + exp(-beta*x)):
        #   exp on the EUP (bf16 on v6e/v7x when input is bf16 -> 2x EUP
        #   throughput, half the vreg pressure), divide as an EUP reciprocal.
        # VALU slot carries only ~3 cheap ops/elem, so the kernel stays
        # HBM-bandwidth bound on every generation (incl. v7x at 3.2 TB/s).
        x = x_ref[...].astype(compute_dtype)
        e = jnp.exp(x * (-beta))  # weakly-typed scalar keeps compute_dtype
        inv = pl.reciprocal(e.astype(jnp.float32) + 1.0, approx=approx_recip)
        y = x * inv.astype(compute_dtype)
        o_ref[...] = y.astype(o_ref.dtype)

    return _swish_kernel


def swish(x, beta, *, block_rows=None, min_kernel_elems=262144):
    """Swish/SiLU with slope `beta`. Accepts any shape (e.g. NCHW) and dtype."""
    orig_shape = x.shape
    orig_dtype = x.dtype
    n = x.size

    # Tiny tensors: fixed pallas_call dispatch + pipeline ramp (several us)
    # dwarfs memory time; XLA's fused elementwise chain is already at roofline.
    if n == 0 or n < min_kernel_elems:
        return x * jax.nn.sigmoid(beta * x)

    kind = _tpu_kind()
    is_v7x = ("v7" in kind) or ("tpu7" in kind)
    is_v5e = ("v5e" in kind) or ("v5 lite" in kind) or ("v5lite" in kind)

    itemsize = jnp.dtype(orig_dtype).itemsize
    # dtype-aware minimum sublane multiple: f32 -> 8, bf16/f16 -> 16, int8 -> 32
    sublane = 8 * max(1, 4 // itemsize)
    align_unit = sublane * LANE

    # bf16 compute on chips with a bf16 EUP/VPU (v6e/v7x); f32 otherwise.
    if orig_dtype == jnp.bfloat16 and not is_v5e:
        compute_dtype = jnp.bfloat16
        approx_recip = True   # ~2^-12 rel. error, below bf16 epsilon
    else:
        compute_dtype = jnp.float32
        approx_recip = False

    flat = x.reshape(-1)
    # Kernel handles the sublane-aligned prefix; the (< align_unit) tail is a
    # tiny plain-JAX expression.  No full-tensor pad/slice round-trips.
    n_main = (n // align_unit) * align_unit
    if n_main == 0:
        return x * jax.nn.sigmoid(beta * x)

    if n_main == n:
        main, tail = flat, None
    else:
        main, tail = flat[:n_main], flat[n_main:]

    rows = n_main // LANE
    x2d = main.reshape(rows, LANE)

    # Per-step tile height (see module docstring for the per-generation logic).
    if block_rows is None:
        block_rows = 4096 if is_v7x else 8192
    if is_v7x:
        br = min(block_rows, max(1024, pl.cdiv(rows, 4)))
    else:
        br = block_rows
    br = min(br, rows)
    br = max(sublane, (br // sublane) * sublane)

    grid = (pl.cdiv(rows, br),)  # ragged last block is clipped by Pallas

    out2d = pl.pallas_call(
        _make_swish_kernel(beta, compute_dtype, approx_recip),
        out_shape=jax.ShapeDtypeStruct((rows, LANE), orig_dtype),
        grid=grid,
        in_specs=[pl.BlockSpec((br, LANE), lambda i: (i, 0))],
        out_specs=pl.BlockSpec((br, LANE), lambda i: (i, 0)),
        compiler_params=pltpu.CompilerParams(
            dimension_semantics=("parallel",),
            # 128 MiB physical VMEM on v5e/v6e -> plenty of headroom for 4 MiB
            # tiles; keep 32 MiB on v7x (64 MiB physical).
            vmem_limit_bytes=(32 if is_v7x else 64) * 1024 * 1024,
        ),
        cost_estimate=pl.CostEstimate(
            flops=5 * n_main,
            transcendentals=2 * n_main,
            bytes_accessed=2 * n_main * itemsize,
        ),
    )(x2d)

    out = out2d.reshape(-1)
    if tail is not None:
        # Rare path: x.size not a multiple of sublane*128.  Tail is < align_unit
        # elements, computed by fused XLA and appended.
        tail_out = (tail * jax.nn.sigmoid(beta * tail)).astype(orig_dtype)
        out = jnp.concatenate([out, tail_out])
    return out.reshape(orig_shape)


if __name__ == "__main__":
    key = jax.random.PRNGKey(0)
    beta = 1.5  # deterministic hyperparameter from Swish.__init__

    # 1) NCHW input at the module's small demo shape; force the Pallas kernel
    #    (the default small-input fallback would otherwise handle it in XLA).
    x = jax.random.normal(key, (2, 4, 16, 16), dtype=jnp.float32)
    y = jax.block_until_ready(swish(x, beta, min_kernel_elems=0))
    y_ref = x * jax.nn.sigmoid(beta * x)
    assert y.shape == x.shape and y.dtype == x.dtype
    assert jnp.allclose(y, y_ref, atol=1e-5, rtol=1e-5), "f32 mismatch vs reference"

    # 2) bf16 input exercising the dtype-aware (16,128) tiling + bf16 EUP path.
    kb = jax.random.split(key, 2)[1]
    xb = jax.random.normal(kb, (2, 4, 32, 128), dtype=jnp.bfloat16)
    yb = jax.block_until_ready(swish(xb, beta, min_kernel_elems=0))
    xb32 = xb.astype(jnp.float32)
    yb_ref = xb32 * jax.nn.sigmoid(beta * xb32)
    assert jnp.allclose(yb.astype(jnp.float32), yb_ref, atol=2e-2, rtol=5e-2), \
        "bf16 mismatch vs reference"

    # 3) Unaligned size exercising the plain-JAX tail path (no full-tensor pad).
    ko = jax.random.split(key, 3)[2]
    xo = jax.random.normal(ko, (3, 5, 7, 11), dtype=jnp.float32)
    yo = jax.block_until_ready(swish(xo, beta, min_kernel_elems=0))
    yo_ref = xo * jax.nn.sigmoid(beta * xo)
    assert jnp.allclose(yo, yo_ref, atol=1e-5, rtol=1e-5), "tail-path mismatch"

    print("KERNEL_OK")
</pallas_src>

<mosaic_0001>
module attributes {stable_mosaic.version = 11 : i64} {
  func.func @_swish_kernel(%arg0: i32, %arg1: memref<16x128xf32, #tpu.memory_space<vmem>>, %arg2: memref<16x128xf32, #tpu.memory_space<vmem>>) attributes {dimension_semantics = [#tpu.dimension_semantics<parallel>], iteration_bounds = array<i64: 1>, scalar_prefetch = 0 : i64, scratch_operands = 0 : i64, tpu.core_type = #tpu.core_type<tc>, window_params = [{transform_indices = @transform_0, window_bounds = array<i64: 16, 128>}, {transform_indices = @transform_1, window_bounds = array<i64: 16, 128>}]} {
    %c0 = arith.constant 0 : index
    %c0_0 = arith.constant 0 : index
    %0 = vector.load %arg1[%c0, %c0_0] : memref<16x128xf32, #tpu.memory_space<vmem>>, vector<16x128xf32>
    %cst = arith.constant -1.500000e+00 : f32
    %1 = vector.broadcast %cst : f32 to vector<16x128xf32>
    %2 = arith.mulf %0, %1 : vector<16x128xf32>
    %3 = math.exp %2 : vector<16x128xf32>
    %cst_1 = arith.constant 1.000000e+00 : f32
    %4 = vector.broadcast %cst_1 : f32 to vector<16x128xf32>
    %5 = arith.addf %3, %4 : vector<16x128xf32>
    %6 = tpu.reciprocal %5 : vector<16x128xf32> -> vector<16x128xf32>
    %7 = arith.mulf %0, %6 : vector<16x128xf32>
    %c0_2 = arith.constant 0 : index
    %c0_3 = arith.constant 0 : index
    %8 = vector.load %arg2[%c0_2, %c0_3] : memref<16x128xf32, #tpu.memory_space<vmem>>, vector<16x128xf32>
    tpu.vector_store %arg2[%c0_2, %c0_3], %7 {strides = array<i32>} : memref<16x128xf32, #tpu.memory_space<vmem>>, vector<16x128xf32>,
    return
  }
  func.func @transform_0(%arg0: i32) -> (i32, i32) {
    %c0_i32 = arith.constant 0 : i32
    %c0_i32_0 = arith.constant 0 : i32
    return %arg0, %c0_i32 : i32, i32
  }
  func.func @transform_1(%arg0: i32) -> (i32, i32) {
    %c0_i32 = arith.constant 0 : i32
    %c0_i32_0 = arith.constant 0 : i32
    return %arg0, %c0_i32 : i32, i32
  }
}

</mosaic_0001>

<bundles_post_ra>
// kernel: tpu_custom_call.1
= control target key start
LH: loop header
LB: loop body
LE: loop exit
PB: predicated region body
PF: predicated region fallthrough
CT: control target
= control target key end

     0   :  { %6 = vsyncpa [#allocation3], 0  ;;  %s138_s0 = inlined_call_operand.hbm [shape: f32[16,128], index: 0, kind: input, shape index: {}]   ;;  %s139_s1 = inlined_call_operand.hbm [shape: f32[16,128], index: 1, kind: output, shape index: {}]  }
   0x1   :  { %7 = vsyncpa [#allocation4], 0  ;;  %s112_s6 = smov [#allocation2]  }
   0x2   :  { %s13_s7 = sshll.u32 %s112_s6, 4  ;;  %s14_s7 = int_to_ptr.vmem [resolvable:$true] %s13_s7 }
   0x3   :  { %s76_s8 = scalar_lea.vmem %s14_s7, 256  ;;  %p81_p1 = scmp.lt.s32.totalorder %s14_s7, %s14_s7 }
   0x4   :  { %p77_p0 = scmp.ne.s32.totalorder %s14_s7, %s76_s8  ;;  %p82_p2 = scmp.lt.s32.totalorder %s76_s8, %s76_s8 }
   0x6   :  { %p83_p3 = por %p82_p2, %p81_p1 }
   0x8   :  { %p84_p4 = pnand %p83_p3, %p77_p0 }
   0xa   :  { %87 = shalt.err (!%p84_p4)
}
   0xb   :  { %s113_s9 = smov 128   ;;  %s114_s10 = smov 8  }
   0xc   :  { %19 = dma.hbm_to_vmem [thread:$0]  %s138_s0, 256, %s14_s7, [#allocation3], %s113_s9, %s113_s9, %s114_s10  }
   0xd   :  { %108 = dma.done.wait [#allocation3], 256  }
   0xe   :  { %109 = vsyncadd [#allocation3], 4294967040  ;;  %v23_v0 = vld [vmem:[#allocation2] sm:$0xff]  ;;  %v24_v1 = vld [vmem:[#allocation2 + $0x8] sm:$0xff]  ;;  %s115_s13 = smov [#allocation5]  }
   0xf   :  { %v25_v2 = vmul.f32 -1.5, %v23_v0  ;;  %v26_v3 = vmul.f32 -1.5, %v24_v1  ;;  %s44_s14 = sshll.u32 %s115_s13, 4  ;;  %s45_s14 = int_to_ptr.vmem [resolvable:$true] %s44_s14 }
  0x10   :  { %s88_s0 = scalar_lea.vmem %s45_s14, 256  ;;  %p93_p6 = scmp.lt.s32.totalorder %s45_s14, %s45_s14 }
  0x11   :  { %v27_v4 = vmul.f32 1.442695, %v25_v2  ;;  %v29_v5 = vmul.f32 1.442695, %v26_v3  ;;  %p89_p5 = scmp.ne.s32.totalorder %s45_s14, %s88_s0  ;;  %p94_p7 = scmp.lt.s32.totalorder %s88_s0, %s88_s0 }
  0x13   :  { %60 = vpow2.f32 %v27_v4  ;;  %p95_p8 = por %p94_p7, %p93_p6 }
  0x14   :  { %62 = vpow2.f32 %v29_v5 }
  0x15   :  { %p96_p9 = pnand %p95_p8, %p89_p5 }
  0x20   :  { %v61_v6 = vpop.eup %60 }
  0x21   :  { %v63_v7 = vpop.eup %62  ;;  %v31_v8 = vadd.f32 1.0, %v61_v6 }
  0x22   :  { %v32_v9 = vadd.f32 1.0, %v63_v7 }
  0x23   :  { %64 = vrcp.f32 %v31_v8 }
  0x24   :  { %66 = vrcp.f32 %v32_v9 }
  0x30   :  { %v65_v10 = vpop.eup %64 }
  0x31   :  { %v67_v11 = vpop.eup %66  ;;  %v35_v12 = vmul.f32 %v65_v10, %v23_v0 }
  0x32   :  { %v36_v13 = vmul.f32 %v67_v11, %v24_v1 }
  0x33   :  { %37 = vst [vmem:[#allocation5] sm:$0xff] %v35_v12 }
  0x34   :  { %38 = vst [vmem:[#allocation5 + $0x8] sm:$0xff] %v36_v13 }
  0x35   :  { %99 = shalt.err (!%p96_p9)
}
  0x36   :  { %50 = dma.vmem_to_hbm [thread:$0]  %s45_s14, 256, %s139_s1, [#allocation4], %s113_s9, %s113_s9, %s114_s10  }
  0x37   :  { %110 = dma.done.wait [#allocation4], 256  }
  0x38   :  { %111 = vsyncadd [#allocation4], 4294967040 }
  0x39   :  { %54 = vsyncpa [#allocation3], 1 }
  0x3a   :  { %55 = vsyncpa [#allocation4], 1 }

</bundles_post_ra>
